<compile_context>
chip_gen: v6e
topology: v6e:2x2x1
jax: 0.10.0
libtpu: 0.0.40
codegen_flags: <defaults>
</compile_context>

<pallas_src>
import functools

import jax
import jax.numpy as jnp
from jax.experimental import pallas as pl
from jax.experimental.pallas import tpu as pltpu


def _round_up(n, m):
    return ((n + m - 1) // m) * m


def _pad_to(a, shape):
    pads = tuple((0, t - s) for s, t in zip(a.shape, shape))
    if any(p for _, p in pads):
        return jnp.pad(a, pads)
    return a


def highway_gated_kernel(x_ref, wcat_ref, bcat_ref, o_ref, *, hp):
    # x_ref: (tm, hp) row tile; wcat_ref: (hp, 2*hp) = [W1^T | W2^T];
    # bcat_ref: (1, 2*hp) = [b1 | b2].
    x = x_ref[...]
    # One wide MXU matmul for both linear layers, f32 accumulation.
    h = jnp.dot(x, wcat_ref[...], preferred_element_type=jnp.float32) + bcat_ref[...]
    y = jnp.tanh(h[:, :hp])            # EUP
    gate = jax.nn.sigmoid(h[:, hp:])   # EUP
    # gate*x + (1-gate)*y  ==  y + gate*(x - y): saves one VPU multiply.
    o_ref[...] = (y + gate * (x.astype(jnp.float32) - y)).astype(o_ref.dtype)


def highway_nogate_kernel(x_ref, w1t_ref, b1_ref, o_ref):
    x = x_ref[...]
    y = jnp.tanh(
        jnp.dot(x, w1t_ref[...], preferred_element_type=jnp.float32) + b1_ref[...]
    )
    o_ref[...] = (x.astype(jnp.float32) + y).astype(o_ref.dtype)


def _pallas_highway(x2d, wmat, bmat, kernel, hp, tm, fast):
    """Single pallas_call over a 1-D row grid. `fast=True` adds the riskier
    tuning knobs (single-buffered constant weights, raised VMEM limit); the
    fallback path mirrors the known-good baseline configuration."""
    N = x2d.shape[0]
    nw = wmat.shape[1]
    grid = (pl.cdiv(N, tm),)

    if fast:
        w_kw = {"pipeline_mode": pl.Buffered(1)} if hasattr(pl, "Buffered") else {}
        cparams = pltpu.CompilerParams(
            dimension_semantics=("parallel",),
            vmem_limit_bytes=64 * 1024 * 1024,
        )
    else:
        w_kw = {}
        cparams = pltpu.CompilerParams(dimension_semantics=("parallel",))

    return pl.pallas_call(
        kernel,
        out_shape=jax.ShapeDtypeStruct((N, hp), x2d.dtype),
        grid_spec=pltpu.PrefetchScalarGridSpec(
            num_scalar_prefetch=0,
            grid=grid,
            in_specs=[
                pl.BlockSpec((tm, hp), lambda i: (i, 0)),        # x row tile
                pl.BlockSpec((hp, nw), lambda i: (0, 0), **w_kw),  # fused weights (resident)
                pl.BlockSpec((1, nw), lambda i: (0, 0), **w_kw),   # fused biases
            ],
            out_specs=pl.BlockSpec((tm, hp), lambda i: (i, 0)),
        ),
        compiler_params=cparams,
    )(x2d, wmat, bmat)


def highway_forward(x, w1, b1, w2=None, b2=None, *, with_gate=True, tm=256):
    """x: (batch, seq, hidden) float32.
    w1/w2: (H, H) PyTorch Linear weights (out_features, in_features).
    b1/b2: (H,)."""
    B, S, H = x.shape
    N = B * S

    hp = _round_up(H, 128)                     # lane-dense hidden dim
    tm_eff = max(8, min(tm, _round_up(N, 8)))  # big MXU-friendly tile, clamped for small N

    x2d = x.reshape(N, H)
    if hp != H:
        x2d = jnp.pad(x2d, ((0, 0), (0, hp - H)))

    # Pre-transpose (and zero-pad) weights so the kernel computes plain x @ Wt.
    w1t = _pad_to(w1.T, (hp, hp))
    b1p = _pad_to(b1, (hp,))

    if with_gate:
        w2t = _pad_to(w2.T, (hp, hp))
        b2p = _pad_to(b2, (hp,))
        wmat = jnp.concatenate([w1t, w2t], axis=1)          # (hp, 2*hp)
        bmat = jnp.concatenate([b1p, b2p]).reshape(1, 2 * hp)
        kernel = functools.partial(highway_gated_kernel, hp=hp)
    else:
        wmat = w1t
        bmat = b1p.reshape(1, hp)
        kernel = highway_nogate_kernel

    try:
        out2d = _pallas_highway(x2d, wmat, bmat, kernel, hp, tm_eff, fast=True)
    except Exception:
        # Conservative fallback: default (double-buffered) specs, default VMEM limit.
        out2d = _pallas_highway(x2d, wmat, bmat, kernel, hp, tm_eff, fast=False)

    if hp != H:
        out2d = out2d[:, :H]
    return out2d.reshape(B, S, H)


def reference_highway(x, w1, b1, w2, b2):
    y = jnp.tanh(jnp.einsum("bsh,oh->bso", x, w1) + b1)
    gate = jax.nn.sigmoid(jnp.einsum("bsh,oh->bso", x, w2) + b2)
    return gate * x + (1.0 - gate) * y


def reference_highway_nogate(x, w1, b1):
    return x + jnp.tanh(jnp.einsum("bsh,oh->bso", x, w1) + b1)


if __name__ == "__main__":
    batch, seq, hidden = 2, 8, 32

    key = jax.random.PRNGKey(0)
    kx, kw1, kb1, kw2, kb2 = jax.random.split(key, 5)

    # Deterministic synthetic parameters (PyTorch Linear shapes: (out, in), (out,)).
    bound = 1.0 / jnp.sqrt(float(hidden))
    x = jax.random.normal(kx, (batch, seq, hidden), dtype=jnp.float32)
    w1 = jax.random.uniform(kw1, (hidden, hidden), minval=-bound, maxval=bound, dtype=jnp.float32)
    b1 = jax.random.uniform(kb1, (hidden,), minval=-bound, maxval=bound, dtype=jnp.float32)
    w2 = jax.random.uniform(kw2, (hidden, hidden), minval=-bound, maxval=bound, dtype=jnp.float32)
    b2 = jax.random.uniform(kb2, (hidden,), minval=-bound, maxval=bound, dtype=jnp.float32)

    # Gated path (module default).
    out = highway_forward(x, w1, b1, w2, b2, with_gate=True)
    out = jax.block_until_ready(out)
    ref = reference_highway(x, w1, b1, w2, b2)
    assert out.shape == (batch, seq, hidden)
    assert jnp.allclose(out, ref, atol=1e-5, rtol=1e-5), "gated mismatch vs reference"

    # Ungated path (with_gate=False).
    out_ng = highway_forward(x, w1, b1, with_gate=False)
    out_ng = jax.block_until_ready(out_ng)
    ref_ng = reference_highway_nogate(x, w1, b1)
    assert jnp.allclose(out_ng, ref_ng, atol=1e-5, rtol=1e-5), "no-gate mismatch vs reference"

    print("KERNEL_OK")
</pallas_src>

<mosaic_0001>
module attributes {stable_mosaic.version = 11 : i64} {
  func.func @highway_gated_kernel(%arg0: i32, %arg1: memref<16x128xf32, #tpu.memory_space<vmem>>, %arg2: memref<128x256xf32, #tpu.memory_space<vmem>>, %arg3: memref<1x256xf32, #tpu.memory_space<vmem>>, %arg4: memref<16x128xf32, #tpu.memory_space<vmem>>) attributes {dimension_semantics = [#tpu.dimension_semantics<parallel>], iteration_bounds = array<i64: 1>, scalar_prefetch = 0 : i64, scratch_operands = 0 : i64, tpu.core_type = #tpu.core_type<tc>, window_params = [{transform_indices = @transform_0, window_bounds = array<i64: 16, 128>}, {pipeline_mode = #tpu.pipeline_mode<synchronous>, transform_indices = @transform_1, window_bounds = array<i64: 128, 256>}, {pipeline_mode = #tpu.pipeline_mode<synchronous>, transform_indices = @transform_2, window_bounds = array<i64: 1, 256>}, {transform_indices = @transform_3, window_bounds = array<i64: 16, 128>}]} {
    %c0 = arith.constant 0 : index
    %c0_0 = arith.constant 0 : index
    %0 = vector.load %arg1[%c0, %c0_0] : memref<16x128xf32, #tpu.memory_space<vmem>>, vector<16x128xf32>
    %c0_1 = arith.constant 0 : index
    %c0_2 = arith.constant 0 : index
    %1 = vector.load %arg2[%c0_1, %c0_2] : memref<128x256xf32, #tpu.memory_space<vmem>>, vector<128x256xf32>
    %cst = arith.constant dense<0.000000e+00> : vector<16x256xf32>
    %2 = tpu.matmul %0, %1, %cst {dimension_numbers = #tpu.dot_dimension_numbers<[1], [0], [0], [1], [0, 0, 1, 1], [], []>} : vector<16x128xf32>, vector<128x256xf32>, vector<16x256xf32> -> vector<16x256xf32>
    %c0_3 = arith.constant 0 : index
    %c0_4 = arith.constant 0 : index
    %3 = vector.load %arg3[%c0_3, %c0_4] : memref<1x256xf32, #tpu.memory_space<vmem>>, vector<1x256xf32>
    %4 = vector.broadcast %3 : vector<1x256xf32> to vector<16x256xf32>
    %5 = arith.addf %2, %4 : vector<16x256xf32>
    %6 = vector.extract_strided_slice %5 {offsets = [0, 0], sizes = [16, 128], strides = [1, 1]} : vector<16x256xf32> to vector<16x128xf32>
    %7 = math.tanh %6 : vector<16x128xf32>
    %8 = vector.extract_strided_slice %5 {offsets = [0, 128], sizes = [16, 128], strides = [1, 1]} : vector<16x256xf32> to vector<16x128xf32>
    %9 = arith.negf %8 : vector<16x128xf32>
    %10 = math.exp %9 : vector<16x128xf32>
    %cst_5 = arith.constant 1.000000e+00 : f32
    %11 = vector.broadcast %cst_5 : f32 to vector<16x128xf32>
    %12 = arith.addf %11, %10 : vector<16x128xf32>
    %13 = arith.divf %11, %12 : vector<16x128xf32>
    %14 = arith.subf %0, %7 : vector<16x128xf32>
    %15 = arith.mulf %13, %14 : vector<16x128xf32>
    %16 = arith.addf %7, %15 : vector<16x128xf32>
    %c0_6 = arith.constant 0 : index
    %c0_7 = arith.constant 0 : index
    %17 = vector.load %arg4[%c0_6, %c0_7] : memref<16x128xf32, #tpu.memory_space<vmem>>, vector<16x128xf32>
    tpu.vector_store %arg4[%c0_6, %c0_7], %16 {strides = array<i32>} : memref<16x128xf32, #tpu.memory_space<vmem>>, vector<16x128xf32>,
    return
  }
  func.func @transform_0(%arg0: i32) -> (i32, i32) {
    %c0_i32 = arith.constant 0 : i32
    %c0_i32_0 = arith.constant 0 : i32
    return %arg0, %c0_i32 : i32, i32
  }
  func.func @transform_1(%arg0: i32) -> (i32, i32) {
    %c0_i32 = arith.constant 0 : i32
    %c0_i32_0 = arith.constant 0 : i32
    %c0_i32_1 = arith.constant 0 : i32
    return %c0_i32, %c0_i32_0 : i32, i32
  }
  func.func @transform_2(%arg0: i32) -> (i32, i32) {
    %c0_i32 = arith.constant 0 : i32
    %c0_i32_0 = arith.constant 0 : i32
    %c0_i32_1 = arith.constant 0 : i32
    return %c0_i32, %c0_i32_0 : i32, i32
  }
  func.func @transform_3(%arg0: i32) -> (i32, i32) {
    %c0_i32 = arith.constant 0 : i32
    %c0_i32_0 = arith.constant 0 : i32
    return %arg0, %c0_i32 : i32, i32
  }
}

module attributes {stable_mosaic.version = 11 : i64} {
  func.func @highway_gated_kernel(%arg0: i32, %arg1: memref<16x128xf32, #tpu.memory_space<vmem>>, %arg2: memref<128x256xf32, #tpu.memory_space<vmem>>, %arg3: memref<1x256xf32, #tpu.memory_space<vmem>>, %arg4: memref<16x128xf32, #tpu.memory_space<vmem>>) attributes {dimension_semantics = [#tpu.dimension_semantics<parallel>], iteration_bounds = array<i64: 1>, scalar_prefetch = 0 : i64, scratch_operands = 0 : i64, tpu.core_type = #tpu.core_type<tc>, window_params = [{transform_indices = @transform_0, window_bounds = array<i64: 16, 128>}, {pipeline_mode = #tpu.pipeline_mode<synchronous>, transform_indices = @transform_1, window_bounds = array<i64: 128, 256>}, {pipeline_mode = #tpu.pipeline_mode<synchronous>, transform_indices = @transform_2, window_bounds = array<i64: 1, 256>}, {transform_indices = @transform_3, window_bounds = array<i64: 16, 128>}]} {
    %c0 = arith.constant 0 : index
    %c0_0 = arith.constant 0 : index
    %0 = vector.load %arg1[%c0, %c0_0] : memref<16x128xf32, #tpu.memory_space<vmem>>, vector<16x128xf32>
    %c0_1 = arith.constant 0 : index
    %c0_2 = arith.constant 0 : index
    %1 = vector.load %arg2[%c0_1, %c0_2] : memref<128x256xf32, #tpu.memory_space<vmem>>, vector<128x256xf32>
    %cst = arith.constant dense<0.000000e+00> : vector<16x256xf32>
    %2 = tpu.matmul %0, %1, %cst {dimension_numbers = #tpu.dot_dimension_numbers<[1], [0], [0], [1], [0, 0, 1, 1], [], []>} : vector<16x128xf32>, vector<128x256xf32>, vector<16x256xf32> -> vector<16x256xf32>
    %c0_3 = arith.constant 0 : index
    %c0_4 = arith.constant 0 : index
    %3 = vector.load %arg3[%c0_3, %c0_4] : memref<1x256xf32, #tpu.memory_space<vmem>>, vector<1x256xf32>
    %4 = vector.broadcast %3 : vector<1x256xf32> to vector<16x256xf32>
    %5 = arith.addf %2, %4 : vector<16x256xf32>
    %6 = vector.extract_strided_slice %5 {offsets = [0, 0], sizes = [16, 128], strides = [1, 1]} : vector<16x256xf32> to vector<16x128xf32>
    %7 = math.tanh %6 : vector<16x128xf32>
    %8 = vector.extract_strided_slice %5 {offsets = [0, 128], sizes = [16, 128], strides = [1, 1]} : vector<16x256xf32> to vector<16x128xf32>
    %9 = arith.negf %8 : vector<16x128xf32>
    %10 = math.exp %9 : vector<16x128xf32>
    %cst_5 = arith.constant 1.000000e+00 : f32
    %11 = vector.broadcast %cst_5 : f32 to vector<16x128xf32>
    %12 = arith.addf %11, %10 : vector<16x128xf32>
    %13 = arith.divf %11, %12 : vector<16x128xf32>
    %14 = arith.subf %0, %7 : vector<16x128xf32>
    %15 = arith.mulf %13, %14 : vector<16x128xf32>
    %16 = arith.addf %7, %15 : vector<16x128xf32>
    %c0_6 = arith.constant 0 : index
    %c0_7 = arith.constant 0 : index
    %17 = vector.load %arg4[%c0_6, %c0_7] : memref<16x128xf32, #tpu.memory_space<vmem>>, vector<16x128xf32>
    tpu.vector_store %arg4[%c0_6, %c0_7], %16 {strides = array<i32>} : memref<16x128xf32, #tpu.memory_space<vmem>>, vector<16x128xf32>,
    return
  }
  func.func @transform_0(%arg0: i32) -> (i32, i32) {
    %c0_i32 = arith.constant 0 : i32
    %c0_i32_0 = arith.constant 0 : i32
    return %arg0, %c0_i32 : i32, i32
  }
  func.func @transform_1(%arg0: i32) -> (i32, i32) {
    %c0_i32 = arith.constant 0 : i32
    %c0_i32_0 = arith.constant 0 : i32
    %c0_i32_1 = arith.constant 0 : i32
    return %c0_i32, %c0_i32_0 : i32, i32
  }
  func.func @transform_2(%arg0: i32) -> (i32, i32) {
    %c0_i32 = arith.constant 0 : i32
    %c0_i32_0 = arith.constant 0 : i32
    %c0_i32_1 = arith.constant 0 : i32
    return %c0_i32, %c0_i32_0 : i32, i32
  }
  func.func @transform_3(%arg0: i32) -> (i32, i32) {
    %c0_i32 = arith.constant 0 : i32
    %c0_i32_0 = arith.constant 0 : i32
    return %arg0, %c0_i32 : i32, i32
  }
}

</mosaic_0001>

<bundles_post_ra>
// kernel: tpu_custom_call.1
= control target key start
LH: loop header
LB: loop body
LE: loop exit
PB: predicated region body
PF: predicated region fallthrough
CT: control target
= control target key end

     0   :  { %8 = vsyncpa [#allocation3], 0  ;;  %s372_s0 = inlined_call_operand.hbm [shape: f32[16,128], index: 0, kind: input, shape index: {}]   ;;  %s373_s1 = inlined_call_operand.hbm [shape: f32[128,256], index: 1, kind: input, shape index: {}]   ;;  %s374_s2 = inlined_call_operand.vmem [shape: f32[1,256], index: 2, kind: input, shape index: {}]   ;;  %s375_s3 = inlined_call_operand.hbm [shape: f32[16,128], index: 3, kind: output, shape index: {}]  }
   0x1   :  { %9 = vsyncpa [#allocation6], 0 }
   0x2   :  { %10 = vsyncpa [#allocation4], 0  ;;  %s326_s12 = smov [#allocation2]  }
   0x3   :  { %s16_s13 = sshll.u32 %s326_s12, 4  ;;  %s17_s13 = int_to_ptr.vmem [resolvable:$true] %s16_s13 }
   0x4   :  { %s268_s14 = scalar_lea.vmem %s17_s13, 256  ;;  %p273_p1 = scmp.lt.s32.totalorder %s17_s13, %s17_s13 }
   0x5   :  { %p269_p0 = scmp.ne.s32.totalorder %s17_s13, %s268_s14  ;;  %p274_p2 = scmp.lt.s32.totalorder %s268_s14, %s268_s14 }
   0x7   :  { %p275_p3 = por %p274_p2, %p273_p1 }
   0x9   :  { %p276_p4 = pnand %p275_p3, %p269_p0 }
   0xb   :  { %279 = shalt.err (!%p276_p4)
}
   0xc   :  { %s327_s15 = smov 128   ;;  %s328_s16 = smov 8  }
   0xd   :  { %22 = dma.hbm_to_vmem [thread:$0]  %s372_s0, 256, %s17_s13, [#allocation3], %s327_s15, %s327_s15, %s328_s16  }
   0xe   :  { %s329_s19 = smov [#allocation5]  }
   0xf   :  { %s28_s20 = sshll.u32 %s329_s19, 4  ;;  %s29_s20 = int_to_ptr.vmem [resolvable:$true] %s28_s20 }
  0x10   :  { %s288_s21 = scalar_lea.vmem %s29_s20, 4096  ;;  %p293_p6 = scmp.lt.s32.totalorder %s29_s20, %s29_s20 }
  0x11   :  { %p289_p5 = scmp.ne.s32.totalorder %s29_s20, %s288_s21  ;;  %p294_p7 = scmp.lt.s32.totalorder %s288_s21, %s288_s21 }
  0x13   :  { %p295_p8 = por %p294_p7, %p293_p6 }
  0x15   :  { %p296_p9 = pnand %p295_p8, %p289_p5 }
  0x17   :  { %299 = shalt.err (!%p296_p9)
}
  0x18   :  { %s330_s22 = smov 256   ;;  %s331_s23 = smov 16  }
  0x19   :  { %34 = dma.hbm_to_vmem [thread:$0]  %s373_s1, 4096, %s29_s20, [#allocation6], %s330_s22, %s330_s22, %s331_s23  }
  0x1a   :  { %320 = dma.done.wait [#allocation3], 256  }
  0x1b   :  { %321 = vsyncadd [#allocation3], 4294967040 }
  0x1c   :  { %322 = dma.done.wait [#allocation6], 4096  }
  0x1d   :  { %323 = vsyncadd [#allocation6], 4294963200  ;;  %v332_v0 = vmov 0.0   ;;  %v76_v1 = vld [vmem:[#allocation5 + $0xf8] sm:$0xff]  ;;  %v75_v2 = vld [vmem:[#allocation5 + $0xf0] sm:$0xff]  ;;  %v79_v35 = vlaneseq }
  0x1e   :  { %153 = vmatprep.mubr.f32.mxu0 %v332_v0  ;;  %159 = vmatprep.mubr.f32.mxu1 %v332_v0  ;;  %v74_v3 = vld [vmem:[#allocation5 + $0xe8] sm:$0xff]  ;;  %v73_v4 = vld [vmem:[#allocation5 + $0xe0] sm:$0xff]  ;;  %v72_v5 = vld [vmem:[#allocation5 + $0xd8] sm:$0xff] }
  0x1f   :  { %89 = vmatprep.subr.mxu0 %v76_v1  ;;  %208 = vmatprep.subr.mxu1 %v76_v1  ;;  %v71_v6 = vld [vmem:[#allocation5 + $0xd0] sm:$0xff]  ;;  %v70_v7 = vld [vmem:[#allocation5 + $0xc8] sm:$0xff]  ;;  %v69_v8 = vld [vmem:[#allocation5 + $0xc0] sm:$0xff]  ;;  %v80_v36 = vshrl.u32 %v79_v35, 7 }
  0x20   :  { %90 = vmatpush1.msra.mxu0 %v75_v2  ;;  %224 = vmatpush1.msra.mxu1 %v75_v2  ;;  %v68_v9 = vld [vmem:[#allocation5 + $0xb8] sm:$0xff]  ;;  %v67_v10 = vld [vmem:[#allocation5 + $0xb0] sm:$0xff]  ;;  %v66_v11 = vld [vmem:[#allocation5 + $0xa8] sm:$0xff] }
  0x21   :  { %91 = vmatprep.subr.mxu0 %v74_v3  ;;  %209 = vmatprep.subr.mxu1 %v74_v3  ;;  %v65_v12 = vld [vmem:[#allocation5 + $0xa0] sm:$0xff]  ;;  %v64_v13 = vld [vmem:[#allocation5 + $0x98] sm:$0xff]  ;;  %v63_v14 = vld [vmem:[#allocation5 + $0x90] sm:$0xff]  ;;  %v85_v37 = vsub.s32 1, %v80_v36  ;;  %v81_v48 = vsub.s32 0, %v80_v36 }
  0x22   :  { %92 = vmatpush1.msra.mxu0 %v73_v4  ;;  %225 = vmatpush1.msra.mxu1 %v73_v4  ;;  %v62_v15 = vld [vmem:[#allocation5 + $0x88] sm:$0xff]  ;;  %v61_v16 = vld [vmem:[#allocation5 + $0x80] sm:$0xff]  ;;  %v60_v17 = vld [vmem:[#allocation5 + $0x78] sm:$0xff] }
  0x23   :  { %93 = vmatprep.subr.mxu0 %v72_v5  ;;  %210 = vmatprep.subr.mxu1 %v72_v5  ;;  %v59_v18 = vld [vmem:[#allocation5 + $0x70] sm:$0xff]  ;;  %v58_v19 = vld [vmem:[#allocation5 + $0x68] sm:$0xff]  ;;  %v57_v20 = vld [vmem:[#allocation5 + $0x60] sm:$0xff] }
  0x24   :  { %94 = vmatpush1.msra.mxu0 %v71_v6  ;;  %226 = vmatpush1.msra.mxu1 %v71_v6  ;;  %v56_v21 = vld [vmem:[#allocation5 + $0x58] sm:$0xff]  ;;  %v55_v22 = vld [vmem:[#allocation5 + $0x50] sm:$0xff]  ;;  %v54_v23 = vld [vmem:[#allocation5 + $0x48] sm:$0xff] }
  0x25   :  { %95 = vmatprep.subr.mxu0 %v70_v7  ;;  %211 = vmatprep.subr.mxu1 %v70_v7  ;;  %v53_v24 = vld [vmem:[#allocation5 + $0x40] sm:$0xff]  ;;  %v52_v25 = vld [vmem:[#allocation5 + $0x38] sm:$0xff]  ;;  %v51_v26 = vld [vmem:[#allocation5 + $0x30] sm:$0xff] }
  0x26   :  { %96 = vmatpush1.msra.mxu0 %v69_v8  ;;  %227 = vmatpush1.msra.mxu1 %v69_v8  ;;  %v50_v27 = vld [vmem:[#allocation5 + $0x28] sm:$0xff]  ;;  %v49_v28 = vld [vmem:[#allocation5 + $0x20] sm:$0xff]  ;;  %v48_v29 = vld [vmem:[#allocation5 + $0x18] sm:$0xff] }
  0x27   :  { %97 = vmatprep.subr.mxu0 %v68_v9  ;;  %212 = vmatprep.subr.mxu1 %v68_v9  ;;  %v47_v30 = vld [vmem:[#allocation5 + $0x10] sm:$0xff]  ;;  %v46_v31 = vld [vmem:[#allocation5 + $0x8] sm:$0xff]  ;;  %v45_v32 = vld [vmem:[#allocation5] sm:$0xff] }
  0x28   :  { %98 = vmatpush1.msra.mxu0 %v67_v10  ;;  %228 = vmatpush1.msra.mxu1 %v67_v10  ;;  %v43_v33 = vld [vmem:[#allocation2] sm:$0xff]  ;;  %v44_v34 = vld [vmem:[#allocation2 + $0x8] sm:$0xff] }
  0x29   :  { %99 = vmatprep.subr.mxu0 %v66_v11  ;;  %213 = vmatprep.subr.mxu1 %v66_v11  ;;  %v77_v38 = vld [vmem:[%s374_s2] sm:$0x3]  ;;  %s333_s2 = smov [#allocation7]  }
  0x2a   :  { %100 = vmatpush1.msra.mxu0 %v65_v12  ;;  %229 = vmatpush1.msra.mxu1 %v65_v12  ;;  %v86_v39 = vrot.slane %v77_v38, %v85_v37  ;;  %v82_v49 = vrot.slane %v77_v38, %v81_v48  ;;  %s193_s26 = sshll.u32 %s333_s2, 4  ;;  %s194_s26 = int_to_ptr.vmem [resolvable:$true] %s193_s26 }
  0x2b   :  { %101 = vmatprep.subr.mxu0 %v64_v13  ;;  %214 = vmatprep.subr.mxu1 %v64_v13  ;;  %s300_s27 = scalar_lea.vmem %s194_s26, 256  ;;  %p305_p11 = scmp.lt.s32.totalorder %s194_s26, %s194_s26 }
  0x2c   :  { %102 = vmatpush1.msra.mxu0 %v63_v14  ;;  %230 = vmatpush1.msra.mxu1 %v63_v14  ;;  %p301_p10 = scmp.ne.s32.totalorder %s194_s26, %s300_s27  ;;  %p306_p12 = scmp.lt.s32.totalorder %s300_s27, %s300_s27 }
  0x2d   :  { %103 = vmatprep.subr.mxu0 %v62_v15  ;;  %215 = vmatprep.subr.mxu1 %v62_v15 }
  0x2e   :  { %104 = vmatpush1.msra.mxu0 %v61_v16  ;;  %231 = vmatpush1.msra.mxu1 %v61_v16  ;;  %p307_p13 = por %p306_p12, %p305_p11 }
  0x2f   :  { %105 = vmatprep.subr.mxu0 %v60_v17  ;;  %216 = vmatprep.subr.mxu1 %v60_v17 }
  0x30   :  { %106 = vmatpush1.msra.mxu0 %v59_v18  ;;  %232 = vmatpush1.msra.mxu1 %v59_v18  ;;  %p308_p0 = pnand %p307_p13, %p301_p10 }
  0x31   :  { %107 = vmatprep.subr.mxu0 %v58_v19  ;;  %217 = vmatprep.subr.mxu1 %v58_v19 }
  0x32   :  { %108 = vmatpush1.msra.mxu0 %v57_v20  ;;  %233 = vmatpush1.msra.mxu1 %v57_v20 }
  0x33   :  { %109 = vmatprep.subr.mxu0 %v56_v21  ;;  %218 = vmatprep.subr.mxu1 %v56_v21 }
  0x34   :  { %110 = vmatpush1.msra.mxu0 %v55_v22  ;;  %234 = vmatpush1.msra.mxu1 %v55_v22 }
  0x35   :  { %111 = vmatprep.subr.mxu0 %v54_v23  ;;  %219 = vmatprep.subr.mxu1 %v54_v23 }
  0x36   :  { %112 = vmatpush1.msra.mxu0 %v53_v24  ;;  %235 = vmatpush1.msra.mxu1 %v53_v24 }
  0x37   :  { %113 = vmatprep.subr.mxu0 %v52_v25  ;;  %220 = vmatprep.subr.mxu1 %v52_v25 }
  0x38   :  { %114 = vmatpush1.msra.mxu0 %v51_v26  ;;  %236 = vmatpush1.msra.mxu1 %v51_v26 }
  0x39   :  { %115 = vmatprep.subr.mxu0 %v50_v27  ;;  %221 = vmatprep.subr.mxu1 %v50_v27 }
  0x3a   :  { %116 = vmatpush1.msra.mxu0 %v49_v28  ;;  %237 = vmatpush1.msra.mxu1 %v49_v28 }
  0x3b   :  { %117 = vmatprep.subr.mxu0 %v48_v29  ;;  %222 = vmatprep.subr.mxu1 %v48_v29 }
  0x3c   :  { %118 = vmatpush1.msra.mxu0 %v47_v30  ;;  %238 = vmatpush1.msra.mxu1 %v47_v30 }
  0x3d   :  { %119 = vmatprep.subr.mxu0 %v46_v31  ;;  %223 = vmatprep.subr.mxu1 %v46_v31 }
  0x3e   :  { %120 = vmatpush1.msra.mxu0 %v45_v32  ;;  %239 = vmatpush1.msra.mxu1 %v45_v32 }
  0x3f   :  { %154 = vmatmul.mubr.f32.vlgmr.msra.gmra.mxu0 %v43_v33  ;;  %160 = vmatmul.mubr.f32.vlgmr.msra.gmra.mxu1 %v44_v34 }
  0xff   :  { %v155_v40 = vpop.f32.mrf.mxu0  ;;  %v161_v41 = vpop.f32.mrf.mxu1 }
 0x100   :  { %v156_v50 = vadd.f32 %v155_v40, %v82_v49  ;;  %v162_v51 = vadd.f32 %v161_v41, %v82_v49 }
 0x101   :  { %v157_v42 = vpop.f32.mrf.mxu0  ;;  %v163_v43 = vpop.f32.mrf.mxu1 }
 0x102   :  { %v158_v44 = vadd.f32 %v157_v42, %v86_v39  ;;  %v164_v45 = vadd.f32 %v163_v43, %v86_v39 }
 0x104   :  { %v206_v46 = vmul.f32 -1.442695, %v158_v44  ;;  %v207_v47 = vmul.f32 -1.442695, %v164_v45 }
 0x106   :  { %248 = vpow2.f32 %v206_v46 }
 0x107   :  { %250 = vpow2.f32 %v207_v47 }
 0x108   :  { %252 = vtanh.f32 %v156_v50 }
 0x109   :  { %254 = vtanh.f32 %v162_v51 }
 0x113   :  { %v249_v52 = vpop.eup %248 }
 0x114   :  { %v251_v53 = vpop.eup %250  ;;  %v174_v54 = vadd.f32 1.0, %v249_v52 }
 0x115   :  { %v175_v55 = vadd.f32 1.0, %v251_v53  ;;  %v253_v56 = vpop.eup %252 }
 0x116   :  { %256 = vrcp.f32 %v174_v54  ;;  %v255_v57 = vpop.eup %254  ;;  %v180_v58 = vsub.f32 %v43_v33, %v253_v56 }
 0x117   :  { %258 = vrcp.f32 %v175_v55  ;;  %v181_v60 = vsub.f32 %v44_v34, %v255_v57 }
 0x123   :  { %v257_v59 = vpop.eup %256 }
 0x124   :  { %v259_v61 = vpop.eup %258  ;;  %v182_v62 = vmul.f32 %v257_v59, %v180_v58 }
 0x125   :  { %v183_v63 = vmul.f32 %v259_v61, %v181_v60 }
 0x126   :  { %v184_v0 = vadd.f32 %v253_v56, %v182_v62 }
 0x127   :  { %v185_v1 = vadd.f32 %v255_v57, %v183_v63 }
 0x128   :  { %186 = vst [vmem:[#allocation7] sm:$0xff] %v184_v0 }
 0x129   :  { %187 = vst [vmem:[#allocation7 + $0x8] sm:$0xff] %v185_v1 }
 0x12a   :  { %311 = shalt.err (!%p308_p0)
}
 0x12b   :  { %199 = dma.vmem_to_hbm [thread:$0]  %s194_s26, 256, %s375_s3, [#allocation4], %s327_s15, %s327_s15, %s328_s16  }
 0x12c   :  { %324 = dma.done.wait [#allocation4], 256  }
 0x12d   :  { %325 = vsyncadd [#allocation4], 4294967040 }
 0x12e   :  { %203 = vsyncpa [#allocation3], 1 }
 0x12f   :  { %204 = vsyncpa [#allocation6], 1 }
 0x130   :  { %205 = vsyncpa [#allocation4], 1 }

// kernel: tpu_custom_call.1
= control target key start
LH: loop header
LB: loop body
LE: loop exit
PB: predicated region body
PF: predicated region fallthrough
CT: control target
= control target key end

     0   :  { %8 = vsyncpa [#allocation3], 0  ;;  %s372_s0 = inlined_call_operand.hbm [shape: f32[16,128], index: 0, kind: input, shape index: {}]   ;;  %s373_s1 = inlined_call_operand.hbm [shape: f32[128,256], index: 1, kind: input, shape index: {}]   ;;  %s374_s2 = inlined_call_operand.vmem [shape: f32[1,256], index: 2, kind: input, shape index: {}]   ;;  %s375_s3 = inlined_call_operand.hbm [shape: f32[16,128], index: 3, kind: output, shape index: {}]  }
   0x1   :  { %9 = vsyncpa [#allocation6], 0 }
   0x2   :  { %10 = vsyncpa [#allocation4], 0  ;;  %s326_s12 = smov [#allocation2]  }
   0x3   :  { %s16_s13 = sshll.u32 %s326_s12, 4  ;;  %s17_s13 = int_to_ptr.vmem [resolvable:$true] %s16_s13 }
   0x4   :  { %s268_s14 = scalar_lea.vmem %s17_s13, 256  ;;  %p273_p1 = scmp.lt.s32.totalorder %s17_s13, %s17_s13 }
   0x5   :  { %p269_p0 = scmp.ne.s32.totalorder %s17_s13, %s268_s14  ;;  %p274_p2 = scmp.lt.s32.totalorder %s268_s14, %s268_s14 }
   0x7   :  { %p275_p3 = por %p274_p2, %p273_p1 }
   0x9   :  { %p276_p4 = pnand %p275_p3, %p269_p0 }
   0xb   :  { %279 = shalt.err (!%p276_p4)
}
   0xc   :  { %s327_s15 = smov 128   ;;  %s328_s16 = smov 8  }
   0xd   :  { %22 = dma.hbm_to_vmem [thread:$0]  %s372_s0, 256, %s17_s13, [#allocation3], %s327_s15, %s327_s15, %s328_s16  }
   0xe   :  { %s329_s19 = smov [#allocation5]  }
   0xf   :  { %s28_s20 = sshll.u32 %s329_s19, 4  ;;  %s29_s20 = int_to_ptr.vmem [resolvable:$true] %s28_s20 }
  0x10   :  { %s288_s21 = scalar_lea.vmem %s29_s20, 4096  ;;  %p293_p6 = scmp.lt.s32.totalorder %s29_s20, %s29_s20 }
  0x11   :  { %p289_p5 = scmp.ne.s32.totalorder %s29_s20, %s288_s21  ;;  %p294_p7 = scmp.lt.s32.totalorder %s288_s21, %s288_s21 }
  0x13   :  { %p295_p8 = por %p294_p7, %p293_p6 }
  0x15   :  { %p296_p9 = pnand %p295_p8, %p289_p5 }
  0x17   :  { %299 = shalt.err (!%p296_p9)
}
  0x18   :  { %s330_s22 = smov 256   ;;  %s331_s23 = smov 16  }
  0x19   :  { %34 = dma.hbm_to_vmem [thread:$0]  %s373_s1, 4096, %s29_s20, [#allocation6], %s330_s22, %s330_s22, %s331_s23  }
  0x1a   :  { %320 = dma.done.wait [#allocation3], 256  }
  0x1b   :  { %321 = vsyncadd [#allocation3], 4294967040 }
  0x1c   :  { %322 = dma.done.wait [#allocation6], 4096  }
  0x1d   :  { %323 = vsyncadd [#allocation6], 4294963200  ;;  %v332_v0 = vmov 0.0   ;;  %v76_v1 = vld [vmem:[#allocation5 + $0xf8] sm:$0xff]  ;;  %v75_v2 = vld [vmem:[#allocation5 + $0xf0] sm:$0xff]  ;;  %v79_v35 = vlaneseq }
  0x1e   :  { %153 = vmatprep.mubr.f32.mxu0 %v332_v0  ;;  %159 = vmatprep.mubr.f32.mxu1 %v332_v0  ;;  %v74_v3 = vld [vmem:[#allocation5 + $0xe8] sm:$0xff]  ;;  %v73_v4 = vld [vmem:[#allocation5 + $0xe0] sm:$0xff]  ;;  %v72_v5 = vld [vmem:[#allocation5 + $0xd8] sm:$0xff] }
  0x1f   :  { %89 = vmatprep.subr.mxu0 %v76_v1  ;;  %208 = vmatprep.subr.mxu1 %v76_v1  ;;  %v71_v6 = vld [vmem:[#allocation5 + $0xd0] sm:$0xff]  ;;  %v70_v7 = vld [vmem:[#allocation5 + $0xc8] sm:$0xff]  ;;  %v69_v8 = vld [vmem:[#allocation5 + $0xc0] sm:$0xff]  ;;  %v80_v36 = vshrl.u32 %v79_v35, 7 }
  0x20   :  { %90 = vmatpush1.msra.mxu0 %v75_v2  ;;  %224 = vmatpush1.msra.mxu1 %v75_v2  ;;  %v68_v9 = vld [vmem:[#allocation5 + $0xb8] sm:$0xff]  ;;  %v67_v10 = vld [vmem:[#allocation5 + $0xb0] sm:$0xff]  ;;  %v66_v11 = vld [vmem:[#allocation5 + $0xa8] sm:$0xff] }
  0x21   :  { %91 = vmatprep.subr.mxu0 %v74_v3  ;;  %209 = vmatprep.subr.mxu1 %v74_v3  ;;  %v65_v12 = vld [vmem:[#allocation5 + $0xa0] sm:$0xff]  ;;  %v64_v13 = vld [vmem:[#allocation5 + $0x98] sm:$0xff]  ;;  %v63_v14 = vld [vmem:[#allocation5 + $0x90] sm:$0xff]  ;;  %v85_v37 = vsub.s32 1, %v80_v36  ;;  %v81_v48 = vsub.s32 0, %v80_v36 }
  0x22   :  { %92 = vmatpush1.msra.mxu0 %v73_v4  ;;  %225 = vmatpush1.msra.mxu1 %v73_v4  ;;  %v62_v15 = vld [vmem:[#allocation5 + $0x88] sm:$0xff]  ;;  %v61_v16 = vld [vmem:[#allocation5 + $0x80] sm:$0xff]  ;;  %v60_v17 = vld [vmem:[#allocation5 + $0x78] sm:$0xff] }
  0x23   :  { %93 = vmatprep.subr.mxu0 %v72_v5  ;;  %210 = vmatprep.subr.mxu1 %v72_v5  ;;  %v59_v18 = vld [vmem:[#allocation5 + $0x70] sm:$0xff]  ;;  %v58_v19 = vld [vmem:[#allocation5 + $0x68] sm:$0xff]  ;;  %v57_v20 = vld [vmem:[#allocation5 + $0x60] sm:$0xff] }
  0x24   :  { %94 = vmatpush1.msra.mxu0 %v71_v6  ;;  %226 = vmatpush1.msra.mxu1 %v71_v6  ;;  %v56_v21 = vld [vmem:[#allocation5 + $0x58] sm:$0xff]  ;;  %v55_v22 = vld [vmem:[#allocation5 + $0x50] sm:$0xff]  ;;  %v54_v23 = vld [vmem:[#allocation5 + $0x48] sm:$0xff] }
  0x25   :  { %95 = vmatprep.subr.mxu0 %v70_v7  ;;  %211 = vmatprep.subr.mxu1 %v70_v7  ;;  %v53_v24 = vld [vmem:[#allocation5 + $0x40] sm:$0xff]  ;;  %v52_v25 = vld [vmem:[#allocation5 + $0x38] sm:$0xff]  ;;  %v51_v26 = vld [vmem:[#allocation5 + $0x30] sm:$0xff] }
  0x26   :  { %96 = vmatpush1.msra.mxu0 %v69_v8  ;;  %227 = vmatpush1.msra.mxu1 %v69_v8  ;;  %v50_v27 = vld [vmem:[#allocation5 + $0x28] sm:$0xff]  ;;  %v49_v28 = vld [vmem:[#allocation5 + $0x20] sm:$0xff]  ;;  %v48_v29 = vld [vmem:[#allocation5 + $0x18] sm:$0xff] }
  0x27   :  { %97 = vmatprep.subr.mxu0 %v68_v9  ;;  %212 = vmatprep.subr.mxu1 %v68_v9  ;;  %v47_v30 = vld [vmem:[#allocation5 + $0x10] sm:$0xff]  ;;  %v46_v31 = vld [vmem:[#allocation5 + $0x8] sm:$0xff]  ;;  %v45_v32 = vld [vmem:[#allocation5] sm:$0xff] }
  0x28   :  { %98 = vmatpush1.msra.mxu0 %v67_v10  ;;  %228 = vmatpush1.msra.mxu1 %v67_v10  ;;  %v43_v33 = vld [vmem:[#allocation2] sm:$0xff]  ;;  %v44_v34 = vld [vmem:[#allocation2 + $0x8] sm:$0xff] }
  0x29   :  { %99 = vmatprep.subr.mxu0 %v66_v11  ;;  %213 = vmatprep.subr.mxu1 %v66_v11  ;;  %v77_v38 = vld [vmem:[%s374_s2] sm:$0x3]  ;;  %s333_s2 = smov [#allocation7]  }
  0x2a   :  { %100 = vmatpush1.msra.mxu0 %v65_v12  ;;  %229 = vmatpush1.msra.mxu1 %v65_v12  ;;  %v86_v39 = vrot.slane %v77_v38, %v85_v37  ;;  %v82_v49 = vrot.slane %v77_v38, %v81_v48  ;;  %s193_s26 = sshll.u32 %s333_s2, 4  ;;  %s194_s26 = int_to_ptr.vmem [resolvable:$true] %s193_s26 }
  0x2b   :  { %101 = vmatprep.subr.mxu0 %v64_v13  ;;  %214 = vmatprep.subr.mxu1 %v64_v13  ;;  %s300_s27 = scalar_lea.vmem %s194_s26, 256  ;;  %p305_p11 = scmp.lt.s32.totalorder %s194_s26, %s194_s26 }
  0x2c   :  { %102 = vmatpush1.msra.mxu0 %v63_v14  ;;  %230 = vmatpush1.msra.mxu1 %v63_v14  ;;  %p301_p10 = scmp.ne.s32.totalorder %s194_s26, %s300_s27  ;;  %p306_p12 = scmp.lt.s32.totalorder %s300_s27, %s300_s27 }
  0x2d   :  { %103 = vmatprep.subr.mxu0 %v62_v15  ;;  %215 = vmatprep.subr.mxu1 %v62_v15 }
  0x2e   :  { %104 = vmatpush1.msra.mxu0 %v61_v16  ;;  %231 = vmatpush1.msra.mxu1 %v61_v16  ;;  %p307_p13 = por %p306_p12, %p305_p11 }
  0x2f   :  { %105 = vmatprep.subr.mxu0 %v60_v17  ;;  %216 = vmatprep.subr.mxu1 %v60_v17 }
  0x30   :  { %106 = vmatpush1.msra.mxu0 %v59_v18  ;;  %232 = vmatpush1.msra.mxu1 %v59_v18  ;;  %p308_p0 = pnand %p307_p13, %p301_p10 }
  0x31   :  { %107 = vmatprep.subr.mxu0 %v58_v19  ;;  %217 = vmatprep.subr.mxu1 %v58_v19 }
  0x32   :  { %108 = vmatpush1.msra.mxu0 %v57_v20  ;;  %233 = vmatpush1.msra.mxu1 %v57_v20 }
  0x33   :  { %109 = vmatprep.subr.mxu0 %v56_v21  ;;  %218 = vmatprep.subr.mxu1 %v56_v21 }
  0x34   :  { %110 = vmatpush1.msra.mxu0 %v55_v22  ;;  %234 = vmatpush1.msra.mxu1 %v55_v22 }
  0x35   :  { %111 = vmatprep.subr.mxu0 %v54_v23  ;;  %219 = vmatprep.subr.mxu1 %v54_v23 }
  0x36   :  { %112 = vmatpush1.msra.mxu0 %v53_v24  ;;  %235 = vmatpush1.msra.mxu1 %v53_v24 }
  0x37   :  { %113 = vmatprep.subr.mxu0 %v52_v25  ;;  %220 = vmatprep.subr.mxu1 %v52_v25 }
  0x38   :  { %114 = vmatpush1.msra.mxu0 %v51_v26  ;;  %236 = vmatpush1.msra.mxu1 %v51_v26 }
  0x39   :  { %115 = vmatprep.subr.mxu0 %v50_v27  ;;  %221 = vmatprep.subr.mxu1 %v50_v27 }
  0x3a   :  { %116 = vmatpush1.msra.mxu0 %v49_v28  ;;  %237 = vmatpush1.msra.mxu1 %v49_v28 }
  0x3b   :  { %117 = vmatprep.subr.mxu0 %v48_v29  ;;  %222 = vmatprep.subr.mxu1 %v48_v29 }
  0x3c   :  { %118 = vmatpush1.msra.mxu0 %v47_v30  ;;  %238 = vmatpush1.msra.mxu1 %v47_v30 }
  0x3d   :  { %119 = vmatprep.subr.mxu0 %v46_v31  ;;  %223 = vmatprep.subr.mxu1 %v46_v31 }
  0x3e   :  { %120 = vmatpush1.msra.mxu0 %v45_v32  ;;  %239 = vmatpush1.msra.mxu1 %v45_v32 }
  0x3f   :  { %154 = vmatmul.mubr.f32.vlgmr.msra.gmra.mxu0 %v43_v33  ;;  %160 = vmatmul.mubr.f32.vlgmr.msra.gmra.mxu1 %v44_v34 }
  0xff   :  { %v155_v40 = vpop.f32.mrf.mxu0  ;;  %v161_v41 = vpop.f32.mrf.mxu1 }
 0x100   :  { %v156_v50 = vadd.f32 %v155_v40, %v82_v49  ;;  %v162_v51 = vadd.f32 %v161_v41, %v82_v49 }
 0x101   :  { %v157_v42 = vpop.f32.mrf.mxu0  ;;  %v163_v43 = vpop.f32.mrf.mxu1 }
 0x102   :  { %v158_v44 = vadd.f32 %v157_v42, %v86_v39  ;;  %v164_v45 = vadd.f32 %v163_v43, %v86_v39 }
 0x104   :  { %v206_v46 = vmul.f32 -1.442695, %v158_v44  ;;  %v207_v47 = vmul.f32 -1.442695, %v164_v45 }
 0x106   :  { %248 = vpow2.f32 %v206_v46 }
 0x107   :  { %250 = vpow2.f32 %v207_v47 }
 0x108   :  { %252 = vtanh.f32 %v156_v50 }
 0x109   :  { %254 = vtanh.f32 %v162_v51 }
 0x113   :  { %v249_v52 = vpop.eup %248 }
 0x114   :  { %v251_v53 = vpop.eup %250  ;;  %v174_v54 = vadd.f32 1.0, %v249_v52 }
 0x115   :  { %v175_v55 = vadd.f32 1.0, %v251_v53  ;;  %v253_v56 = vpop.eup %252 }
 0x116   :  { %256 = vrcp.f32 %v174_v54  ;;  %v255_v57 = vpop.eup %254  ;;  %v180_v58 = vsub.f32 %v43_v33, %v253_v56 }
 0x117   :  { %258 = vrcp.f32 %v175_v55  ;;  %v181_v60 = vsub.f32 %v44_v34, %v255_v57 }
 0x123   :  { %v257_v59 = vpop.eup %256 }
 0x124   :  { %v259_v61 = vpop.eup %258  ;;  %v182_v62 = vmul.f32 %v257_v59, %v180_v58 }
 0x125   :  { %v183_v63 = vmul.f32 %v259_v61, %v181_v60 }
 0x126   :  { %v184_v0 = vadd.f32 %v253_v56, %v182_v62 }
 0x127   :  { %v185_v1 = vadd.f32 %v255_v57, %v183_v63 }
 0x128   :  { %186 = vst [vmem:[#allocation7] sm:$0xff] %v184_v0 }
 0x129   :  { %187 = vst [vmem:[#allocation7 + $0x8] sm:$0xff] %v185_v1 }
 0x12a   :  { %311 = shalt.err (!%p308_p0)
}
 0x12b   :  { %199 = dma.vmem_to_hbm [thread:$0]  %s194_s26, 256, %s375_s3, [#allocation4], %s327_s15, %s327_s15, %s328_s16  }
 0x12c   :  { %324 = dma.done.wait [#allocation4], 256  }
 0x12d   :  { %325 = vsyncadd [#allocation4], 4294967040 }
 0x12e   :  { %203 = vsyncpa [#allocation3], 1 }
 0x12f   :  { %204 = vsyncpa [#allocation6], 1 }
 0x130   :  { %205 = vsyncpa [#allocation4], 1 }

</bundles_post_ra>
